<compile_context>
chip_gen: v7x
topology: tpu7x:2x2x1
jax: 0.10.0
libtpu: 0.0.40
codegen_flags: <defaults>
</compile_context>

<pallas_src>
import math

import jax
import jax.numpy as jnp
from jax.experimental import pallas as pl
from jax.experimental.pallas import tpu as pltpu


def _post_bias_kernel(b_ref, x_ref, o_ref):
    # b_ref: (1, tn) or (tm, tn) bias tile in its native dtype.
    # x_ref / o_ref: (tm, tn). Accumulate in f32, cast back on store.
    x = x_ref[...].astype(jnp.float32)
    b = b_ref[...].astype(jnp.float32)
    o_ref[...] = (x + b).astype(o_ref.dtype)


def _sublane_multiple(dtype) -> int:
    return {4: 8, 2: 16, 1: 32}.get(jnp.dtype(dtype).itemsize, 8)


def _default_vmem_budgets():
    """Generation-aware (tile_vmem_bytes, vmem_limit_bytes).

    128-MiB-VMEM chips (v4/v5e/v6e) get big tiles; v7x (64 MiB per
    TensorCore) and unknown devices get conservative defaults.
    """
    kind = ""
    try:
        kind = jax.devices()[0].device_kind.lower()
    except Exception:
        pass
    if "v7" in kind:
        return 16 * 1024 * 1024, 32 * 1024 * 1024
    if any(tag in kind for tag in ("v4", "v5", "v6")):
        return 48 * 1024 * 1024, 96 * 1024 * 1024
    return 16 * 1024 * 1024, 32 * 1024 * 1024


def neuron_post_bias_forward(
    x,
    param,
    *,
    row_tile=None,
    lane_tile=None,
    tile_vmem_bytes=None,     # budget for all double-buffered tiles (in+out+bias)
    vmem_limit_bytes=None,    # Mosaic scoped-VMEM limit
    out_dtype=None,           # default: torch-style promotion of (x, param)
    donate_x=False,
):
    """out = x + bias (bias = param, broadcast over leading dims if needed)."""
    orig_shape = x.shape
    H = orig_shape[-1]
    full_bias = tuple(param.shape) == tuple(orig_shape)
    if not full_bias:
        assert param.size == H, "param must match x.shape or have x.shape[-1] elements"

    if out_dtype is None:
        out_dtype = jnp.promote_types(x.dtype, param.dtype)

    budget_default, limit_default = _default_vmem_budgets()
    if tile_vmem_bytes is None:
        tile_vmem_bytes = budget_default
    if vmem_limit_bytes is None:
        vmem_limit_bytes = limit_default

    rows = math.prod(orig_shape[:-1])
    itemsize_x = jnp.dtype(x.dtype).itemsize
    itemsize_o = jnp.dtype(out_dtype).itemsize
    itemsize_b = jnp.dtype(param.dtype).itemsize

    # Sublane granularity: the row-tile must satisfy every array that is
    # blocked along rows (x, out, and the bias when it is full-shape).
    sub = max(_sublane_multiple(x.dtype), _sublane_multiple(out_dtype))
    if full_bias:
        sub = max(sub, _sublane_multiple(param.dtype))

    # --- Fold rows into lanes when H < 128 so stores are lane-dense. ---------
    rows_eff, H_eff, fold = rows, H, 1
    if H < 128:
        L = math.lcm(H, 128)          # generalized fold (covers H = 96, 100, ...)
        k = L // H
        if rows >= k and rows % k == 0 and L <= 4096:
            fold, rows_eff, H_eff = k, rows // k, L
        # TODO(synk): pad + mask the ragged row tail so sub-128 H keeps
        # lane-dense stores even when rows % k != 0 (currently falls back to
        # masked vst on a <128-lane output).

    x2d = x.reshape(rows_eff, H_eff)
    if full_bias:
        bias2d = param.reshape(rows_eff, H_eff)            # native dtype
    else:
        bias_row = param.reshape(1, H)                     # native dtype
        bias2d = jnp.tile(bias_row, (1, fold)) if fold > 1 else bias_row

    # --- Tile selection (HBM-bandwidth bound: big, VMEM-budgeted tiles). -----
    # Per (row x lane) element, double-buffered bytes resident in VMEM:
    elem_bytes = itemsize_x + itemsize_o + (itemsize_b if full_bias else 0)

    if lane_tile is not None:
        tn = lane_tile
    else:
        # Prefer full rows: contiguous DMAs, effectively 1-D grid, bias block
        # fetched once per row step.
        tn = H_eff
        if tile_vmem_bytes // (2 * tn * elem_bytes) < sub:
            # Full rows too wide for the budget: widest 128-multiple lane tile
            # that still allows tm >= sub.
            max_tn = tile_vmem_bytes // (2 * sub * elem_bytes)
            tn = min(H_eff, max(128, (max_tn // 128) * 128))

    if row_tile is not None:
        tm = row_tile
    else:
        tm = tile_vmem_bytes // (2 * tn * elem_bytes)
        tm = max(sub, (tm // sub) * sub)

    # Keep >= 2 (ideally 4) row-grid steps for pipelining and v7x megacore
    # sharding, but only when the tensor is big enough to benefit.
    total_bytes = rows_eff * H_eff * itemsize_x
    min_row_steps = 1
    if row_tile is None and rows_eff >= 2 * sub and total_bytes >= (1 << 20):
        min_row_steps = 2
        if rows_eff >= 4 * sub and total_bytes >= (4 << 20):
            min_row_steps = 4
    if min_row_steps > 1:
        cap = max(sub, (rows_eff // min_row_steps // sub) * sub)
        tm = min(tm, cap)

    if tm >= rows_eff:
        tm = rows_eff                                       # full extent is always legal

    grid_rows = pl.cdiv(rows_eff, tm)
    grid_lanes = pl.cdiv(H_eff, tn)
    # Row axis innermost: the broadcast (1, tn) bias block index is constant
    # along the inner axis, so it is not re-DMA'd every inner step.
    grid = (grid_lanes, grid_rows)

    if full_bias:
        bias_spec = pl.BlockSpec((tm, tn), lambda j, i: (i, j))
    else:
        bias_spec = pl.BlockSpec((1, tn), lambda j, i: (0, j))
    x_spec = pl.BlockSpec((tm, tn), lambda j, i: (i, j))
    out_spec = pl.BlockSpec((tm, tn), lambda j, i: (i, j))

    call_kwargs = {}
    if donate_x and jnp.dtype(out_dtype) == jnp.dtype(x.dtype):
        # Alias x (input index 1) to the output when the caller no longer needs x.
        call_kwargs["input_output_aliases"] = {1: 0}

    out2d = pl.pallas_call(
        _post_bias_kernel,
        out_shape=jax.ShapeDtypeStruct((rows_eff, H_eff), out_dtype),
        grid_spec=pltpu.PrefetchScalarGridSpec(
            num_scalar_prefetch=0,
            grid=grid,
            in_specs=[bias_spec, x_spec],
            out_specs=out_spec,
        ),
        compiler_params=pltpu.CompilerParams(
            dimension_semantics=("parallel", "parallel"),
            vmem_limit_bytes=vmem_limit_bytes,
        ),
        **call_kwargs,
    )(bias2d, x2d)

    return out2d.reshape(orig_shape)


def _reference(x, param, out_dtype=None):
    if out_dtype is None:
        out_dtype = jnp.promote_types(x.dtype, param.dtype)
    if tuple(param.shape) == tuple(x.shape):
        bias = param
    else:
        bias = param.reshape(x.shape[-1])
    return (x.astype(jnp.float32) + bias.astype(jnp.float32)).astype(out_dtype)


if __name__ == "__main__":
    key = jax.random.PRNGKey(0)
    kx, kp, kq, kr = jax.random.split(key, 4)

    ok = True

    # 1) Default module: param = zeros over last dim -> identity.
    B, S, H = 2, 8, 32
    x = jax.random.normal(kx, (B, S, H), dtype=jnp.float32)
    p0 = jnp.zeros((H,), dtype=jnp.float32)
    out = jax.block_until_ready(neuron_post_bias_forward(x, p0))
    ok &= bool(jnp.allclose(out, _reference(x, p0), atol=1e-6))

    # 2) Nontrivial per-neuron bias broadcast over (B, S).
    p1 = jax.random.normal(kp, (H,), dtype=jnp.float32)
    out = jax.block_until_ready(neuron_post_bias_forward(x, p1))
    ok &= bool(jnp.allclose(out, _reference(x, p1), atol=1e-6))

    # 3) Full-shape bias (param.shape == x.shape branch of get_bias).
    p2 = jax.random.normal(kq, (B, S, H), dtype=jnp.float32)
    out = jax.block_until_ready(neuron_post_bias_forward(x, p2))
    ok &= bool(jnp.allclose(out, _reference(x, p2), atol=1e-6))

    # 4) Ragged rows (rows % row_tile != 0): exercise cdiv grid / masked tail.
    x_r = jax.random.normal(kr, (3, 7, H), dtype=jnp.float32)   # 21 rows
    out = jax.block_until_ready(neuron_post_bias_forward(x_r, p1, row_tile=8))
    ok &= bool(jnp.allclose(out, _reference(x_r, p1), atol=1e-6))

    # 5) 2-D grid over rows and lanes (larger H, forced small tiles).
    H2 = 256
    x2 = jax.random.normal(kx, (4, 4, H2), dtype=jnp.float32)
    p3 = jax.random.normal(kp, (H2,), dtype=jnp.float32)
    out = jax.block_until_ready(
        neuron_post_bias_forward(x2, p3, row_tile=8, lane_tile=128))
    ok &= bool(jnp.allclose(out, _reference(x2, p3), atol=1e-6))

    # 6) bf16 activations + f32 bias: native-dtype bias path, f32-promoted out.
    x_bf = jax.random.normal(kq, (2, 8, 128), dtype=jnp.bfloat16)
    p4 = jax.random.normal(kr, (128,), dtype=jnp.float32)
    out = jax.block_until_ready(neuron_post_bias_forward(x_bf, p4))
    ok &= out.dtype == jnp.float32
    ok &= bool(jnp.allclose(out, _reference(x_bf, p4), atol=1e-2, rtol=1e-2))

    if ok:
        print("KERNEL_OK")
    else:
        raise SystemExit("mismatch vs reference")
</pallas_src>

<mosaic_0001>
module attributes {stable_mosaic.version = 11 : i64} {
  func.func @_post_bias_kernel(%arg0: i32, %arg1: i32, %arg2: memref<1x128xf32, #tpu.memory_space<vmem>>, %arg3: memref<4x128xf32, #tpu.memory_space<vmem>>, %arg4: memref<4x128xf32, #tpu.memory_space<vmem>>) attributes {dimension_semantics = [#tpu.dimension_semantics<parallel>, #tpu.dimension_semantics<parallel>], iteration_bounds = array<i64: 1, 1>, scalar_prefetch = 0 : i64, scratch_operands = 0 : i64, tpu.core_type = #tpu.core_type<tc>, window_params = [{transform_indices = @transform_0, window_bounds = array<i64: 1, 128>}, {transform_indices = @transform_1, window_bounds = array<i64: 4, 128>}, {transform_indices = @transform_2, window_bounds = array<i64: 4, 128>}]} {
    %c0 = arith.constant 0 : index
    %c0_0 = arith.constant 0 : index
    %0 = vector.load %arg3[%c0, %c0_0] : memref<4x128xf32, #tpu.memory_space<vmem>>, vector<4x128xf32>
    %c0_1 = arith.constant 0 : index
    %c0_2 = arith.constant 0 : index
    %1 = vector.load %arg2[%c0_1, %c0_2] : memref<1x128xf32, #tpu.memory_space<vmem>>, vector<1x128xf32>
    %2 = vector.broadcast %1 : vector<1x128xf32> to vector<4x128xf32>
    %3 = arith.addf %0, %2 : vector<4x128xf32>
    %c0_3 = arith.constant 0 : index
    %c0_4 = arith.constant 0 : index
    %4 = vector.load %arg4[%c0_3, %c0_4] : memref<4x128xf32, #tpu.memory_space<vmem>>, vector<4x128xf32>
    tpu.vector_store %arg4[%c0_3, %c0_4], %3 {strides = array<i32>} : memref<4x128xf32, #tpu.memory_space<vmem>>, vector<4x128xf32>,
    return
  }
  func.func @transform_0(%arg0: i32, %arg1: i32) -> (i32, i32) {
    %c0_i32 = arith.constant 0 : i32
    %c0_i32_0 = arith.constant 0 : i32
    return %c0_i32, %arg0 : i32, i32
  }
  func.func @transform_1(%arg0: i32, %arg1: i32) -> (i32, i32) {
    %c0_i32 = arith.constant 0 : i32
    return %arg1, %arg0 : i32, i32
  }
  func.func @transform_2(%arg0: i32, %arg1: i32) -> (i32, i32) {
    %c0_i32 = arith.constant 0 : i32
    return %arg1, %arg0 : i32, i32
  }
}

</mosaic_0001>

<bundles_post_ra>
// kernel: tpu_custom_call.1
= control target key start
LH: loop header
LB: loop body
LE: loop exit
PB: predicated region body
PF: predicated region fallthrough
CT: control target
= control target key end

     0   :  { %7 = vsyncpa [#allocation3], 0  ;;  %s192_s0 = inlined_call_operand.hbm [shape: f32[1,128], index: 0, kind: input, shape index: {}]   ;;  %s193_s1 = inlined_call_operand.hbm [shape: f32[4,128], index: 1, kind: input, shape index: {}]   ;;  %s194_s2 = inlined_call_operand.hbm [shape: f32[4,128], index: 2, kind: output, shape index: {}]  }
   0x1   :  { %8 = vsyncpa [#allocation6], 0 }
   0x2   :  { %9 = vsyncpa [#allocation4], 0  ;;  %s138_s9 = smov [#allocation2]   ;;  %s139_s11 = smov [#allocation5]  }
   0x3   :  { %s16_s10 = sshll.u32 %s138_s9, 4  ;;  %s26_s12 = sshll.u32 %s139_s11, 4  ;;  %s17_s10 = int_to_ptr.vmem [resolvable:$true] %s16_s10  ;;  %s27_s12 = int_to_ptr.vmem [resolvable:$true] %s26_s12 }
   0x4   :  { %s66_s15 = scalar_lea.hbm %s192_s0, 16 }
   0x5   :  { %p67_p0 = scmp.ne.s32.totalorder %s192_s0, %s66_s15  ;;  %p70_p1 = scmp.lt.u32.totalorder %s66_s15, %s192_s0 }
   0x7   :  { %p72_p2 = pnand %p70_p1, %p67_p0 }
   0x9   :  { %75 = shalt.err (!%p72_p2)
}
   0xa   :  { %s76_s20 = scalar_lea.vmem %s17_s10, 16  ;;  %s80_s21 = scalar_lea.vmem %s17_s10, 32 }
   0xb   :  { %p77_p3 = scmp.ne.s32.totalorder %s17_s10, %s76_s20  ;;  %p81_p4 = scmp.lt.s32.totalorder %s17_s10, %s17_s10 }
   0xc   :  { %p82_p5 = scmp.lt.s32.totalorder %s80_s21, %s76_s20 }
   0xe   :  { %p83_p6 = por %p82_p5, %p81_p4 }
  0x10   :  { %p84_p7 = pnand %p83_p6, %p77_p3 }
  0x12   :  { %87 = shalt.err (!%p84_p7)
}
  0x13   :  { %19 = dma.hbm_to_vmem [thread:$0]  %s192_s0, 16, %s17_s10, [#allocation3]  }
  0x14   :  { %s88_s26 = scalar_lea.hbm %s193_s1, 64 }
  0x15   :  { %p89_p8 = scmp.ne.s32.totalorder %s193_s1, %s88_s26  ;;  %p92_p9 = scmp.lt.u32.totalorder %s88_s26, %s193_s1 }
  0x17   :  { %p94_p10 = pnand %p92_p9, %p89_p8 }
  0x19   :  { %97 = shalt.err (!%p94_p10)
}
  0x1a   :  { %s98_s3 = scalar_lea.vmem %s27_s12, 64  ;;  %p103_p12 = scmp.lt.s32.totalorder %s27_s12, %s27_s12 }
  0x1b   :  { %p99_p11 = scmp.ne.s32.totalorder %s27_s12, %s98_s3  ;;  %p104_p13 = scmp.lt.s32.totalorder %s98_s3, %s98_s3 }
  0x1d   :  { %p105_p0 = por %p104_p13, %p103_p12 }
  0x1f   :  { %p106_p1 = pnand %p105_p0, %p99_p11 }
  0x21   :  { %109 = shalt.err (!%p106_p1)
}
  0x22   :  { %29 = dma.hbm_to_vmem [thread:$0]  %s193_s1, 64, %s27_s12, [#allocation6]  }
  0x23   :  { %132 = dma.done.wait [#allocation3], 16  }
  0x24   :  { %133 = vsyncadd [#allocation3], 4294967280 }
  0x25   :  { %134 = dma.done.wait [#allocation6], 64  }
  0x26   :  { %135 = vsyncadd [#allocation6], 4294967232  ;;  %s140_s5 = smov [#allocation7]   ;;  %v36_v0 = vld [vmem:[#allocation5] sm:$0xf] }
  0x27   :  { %s52_s6 = sshll.u32 %s140_s5, 4  ;;  %v62_v1 = vld [vmem:[#allocation2] ss:$0 sm:$0xff]  ;;  %s53_s6 = int_to_ptr.vmem [resolvable:$true] %s52_s6 }
  0x28   :  { %v44_v2 = vadd.f32 %v62_v1, %v36_v0  ;;  %s110_s7 = scalar_lea.vmem %s53_s6, 64  ;;  %p115_p3 = scmp.lt.s32.totalorder %s53_s6, %s53_s6 }
  0x29   :  { %p111_p2 = scmp.ne.s32.totalorder %s53_s6, %s110_s7  ;;  %p116_p4 = scmp.lt.s32.totalorder %s110_s7, %s110_s7 }
  0x2a   :  { %45 = vst [vmem:[#allocation7] sm:$0xf] %v44_v2 }
  0x2b   :  { %p117_p5 = por %p116_p4, %p115_p3 }
  0x2d   :  { %p118_p6 = pnand %p117_p5, %p111_p2 }
  0x2f   :  { %121 = shalt.err (!%p118_p6)
}
  0x30   :  { %s122_s9 = scalar_lea.hbm %s194_s2, 64 }
  0x31   :  { %p123_p7 = scmp.ne.s32.totalorder %s194_s2, %s122_s9  ;;  %p126_p8 = scmp.lt.u32.totalorder %s122_s9, %s194_s2 }
  0x33   :  { %p128_p9 = pnand %p126_p8, %p123_p7 }
  0x35   :  { %131 = shalt.err (!%p128_p9)
}
  0x36   :  { %55 = dma.vmem_to_hbm [thread:$0]  %s53_s6, 64, %s194_s2, [#allocation4]  }
  0x37   :  { %136 = dma.done.wait [#allocation4], 64  }
  0x38   :  { %137 = vsyncadd [#allocation4], 4294967232 }
  0x39   :  { %59 = vsyncpa [#allocation3], 1 }
  0x3a   :  { %60 = vsyncpa [#allocation6], 1 }
  0x3b   :  { %61 = vsyncpa [#allocation4], 1 }

</bundles_post_ra>
